<compile_context>
chip_gen: v6e
topology: v6e:2x2x1
jax: 0.10.0
libtpu: 0.0.40
codegen_flags: <defaults>
</compile_context>

<pallas_src>
import functools

import jax
import jax.numpy as jnp
from jax import lax
from jax.experimental import pallas as pl
from jax.experimental.pallas import tpu as pltpu


def _cbam_kernel(x_ref, w1_ref, b1_ref, w2_ref, b2_ref, kk_ref, bc_ref,
                 out_ref, lhs_ref, *, D, HW):
    """One batch element per grid step.  x_ref/out_ref: (1, C, D*HW)."""
    C = x_ref.shape[1]
    inv_dhw = 1.0 / float(D * HW)
    inv_c = 1.0 / float(C)

    x2d = x_ref[0]                                        # (C, D*HW) lane-dense load

    # ---------------- Channel attention ----------------
    # Single cross-lane reductions over the whole slab.
    s = jnp.sum(x2d, axis=1, keepdims=True)               # (C, 1)
    m = jnp.max(x2d, axis=1, keepdims=True)               # (C, 1)

    # Fused MLP: [avg | max] as the two lanes of one (C, 2) block.
    col = lax.broadcasted_iota(jnp.int32, (C, 2), 1)
    v = jnp.where(col == 0, s * inv_dhw, m)               # (C, 2)
    h = jnp.dot(w1_ref[...], v, preferred_element_type=jnp.float32) + b1_ref[...]
    h = jnp.maximum(h, 0.0)                                # (mid, 2)
    z = jnp.dot(w2_ref[...], h, preferred_element_type=jnp.float32) + b2_ref[...]
    ca = jax.nn.sigmoid(jnp.sum(z, axis=1, keepdims=True))  # (C, 1) = sigmoid(mlp(avg)+mlp(max))

    # Apply channel attention once to the full slab (broadcast hoisted).
    o1 = x2d * ca                                          # (C, D*HW)

    # ---------------- Spatial attention ----------------
    # Channel-mean map via MXU (constant inv_C row @ o1); channel-max via one
    # sublane reduce.  Both cover every depth slice at once.
    ones_row = jnp.full((1, C), inv_c, dtype=jnp.float32)
    avg_flat = jnp.dot(ones_row, o1, preferred_element_type=jnp.float32)  # (1, D*HW)
    max_flat = jnp.max(o1, axis=0, keepdims=True)                         # (1, D*HW)

    # Pack per-depth [avg | max] rows into the (D, 2*HW) LHS scratch (static,
    # 128-aligned lane slices), then ONE batched banded-conv matmul + sigmoid.
    for d in range(D):
        lhs_ref[d:d + 1, 0:HW] = avg_flat[:, d * HW:(d + 1) * HW]
        lhs_ref[d:d + 1, HW:2 * HW] = max_flat[:, d * HW:(d + 1) * HW]

    conv = jnp.dot(lhs_ref[...], kk_ref[...],
                   preferred_element_type=jnp.float32) + bc_ref[0]        # (D, HW)
    sa = jax.nn.sigmoid(conv)                                             # one EUP batch

    # Per-depth spatial scaling; lane-dense, unmasked (HW % 128 == 0) stores.
    for d in range(D):
        out_ref[0, :, d * HW:(d + 1) * HW] = (
            o1[:, d * HW:(d + 1) * HW] * sa[d:d + 1, :]).astype(out_ref.dtype)


def _banded_conv_matrices(wconv, H, W):
    """(HW, HW) banded matrices so the 7x7 zero-padded conv over the avg/max maps
    becomes `map_row @ K` (per depth slice; the conv's depth kernel size is 1)."""
    HW = H * W
    hh = jnp.arange(HW, dtype=jnp.int32) // W
    ww = jnp.arange(HW, dtype=jnp.int32) % W
    dh = hh[:, None] - hh[None, :]            # h_src - h_dst
    dw = ww[:, None] - ww[None, :]            # w_src - w_dst
    valid = (jnp.abs(dh) <= 3) & (jnp.abs(dw) <= 3)
    kh = jnp.clip(dh + 3, 0, 6)
    kw = jnp.clip(dw + 3, 0, 6)
    wa = wconv[0, 0, 0].astype(jnp.float32)   # (7, 7) weights for the avg map
    wm = wconv[0, 1, 0].astype(jnp.float32)   # (7, 7) weights for the max map
    ka = jnp.where(valid, wa[kh, kw], 0.0)
    km = jnp.where(valid, wm[kh, kw], 0.0)
    return ka, km


def build_spatial_conv_matrix(wconv, H, W):
    """Build the vstacked (2*HW, HW) banded conv matrix ONCE per weight set and
    reuse it across forward calls (it only depends on wconv, H, W)."""
    ka, km = _banded_conv_matrices(wconv, H, W)
    return jnp.concatenate([ka, km], axis=0)


def cbam_forward(x_ncdhw, w1, b1, w2, b2, wconv, bconv, kk=None):
    """x_ncdhw: (N, C, D, H, W) like the PyTorch module.  Returns same shape.
    Assumes C % 8 == 0 and (H*W) % 128 == 0 (lane-dense layout)."""
    N, C, D, H, W = x_ncdhw.shape
    HW = H * W
    mid = w1.shape[0]

    if kk is None:                                       # prefer caching this outside
        kk = build_spatial_conv_matrix(wconv, H, W)

    xr = x_ncdhw.reshape(N, C, D * HW).astype(jnp.float32)   # free contiguous merge

    w1_k = w1.astype(jnp.float32)                        # (mid, C)
    b1_k = b1.reshape(mid, 1).astype(jnp.float32)        # (mid, 1)
    w2_k = w2.astype(jnp.float32)                        # (C, mid)
    b2_k = b2.reshape(C, 1).astype(jnp.float32)          # (C, 1)
    kk_k = kk.astype(jnp.float32)                        # (2*HW, HW)
    bc_k = bconv.reshape(1).astype(jnp.float32)          # (1,) scalar -> SMEM

    # Advisory cost estimate (dominated by the batched banded-conv matmul).
    flops = int(N * (2 * D * (2 * HW) * HW        # spatial conv matmul
                     + 2 * C * D * HW             # channel-mean matmul
                     + 3 * C * D * HW             # ca*x, o1*sa, reductions
                     + 8 * mid * C))              # fused MLP
    transcendentals = int(N * (C + D * HW))       # sigmoids
    bytes_accessed = int((2 * N * C * D * HW + 2 * HW * HW
                          + 2 * mid * C + mid + C + 1) * 4)

    kernel = functools.partial(_cbam_kernel, D=D, HW=HW)

    out = pl.pallas_call(
        kernel,
        grid=(N,),
        in_specs=[
            pl.BlockSpec((1, C, D * HW), lambda n: (n, 0, 0)),
            pl.BlockSpec((mid, C), lambda n: (0, 0)),
            pl.BlockSpec((mid, 1), lambda n: (0, 0)),
            pl.BlockSpec((C, mid), lambda n: (0, 0)),
            pl.BlockSpec((C, 1), lambda n: (0, 0)),
            pl.BlockSpec((2 * HW, HW), lambda n: (0, 0)),
            pl.BlockSpec(memory_space=pltpu.MemorySpace.SMEM),
        ],
        out_specs=pl.BlockSpec((1, C, D * HW), lambda n: (n, 0, 0)),
        out_shape=jax.ShapeDtypeStruct((N, C, D * HW), jnp.float32),
        scratch_shapes=[pltpu.VMEM((D, 2 * HW), jnp.float32)],
        compiler_params=pltpu.CompilerParams(dimension_semantics=("parallel",)),
        cost_estimate=pl.CostEstimate(flops=flops,
                                      transcendentals=transcendentals,
                                      bytes_accessed=bytes_accessed),
    )(xr, w1_k, b1_k, w2_k, b2_k, kk_k, bc_k)

    return out.reshape(N, C, D, H, W)                    # free reshape back


def cbam_reference(x, w1, b1, w2, b2, wconv, bconv):
    """Plain-JAX reference mirroring the PyTorch forward (NCDHW)."""
    avg = jnp.mean(x, axis=(2, 3, 4))
    mx = jnp.max(x, axis=(2, 3, 4))

    def mlp(v):
        h = jax.nn.relu(v @ w1.T + b1)
        return h @ w2.T + b2

    ca = jax.nn.sigmoid(mlp(avg) + mlp(mx))[:, :, None, None, None]
    out1 = ca * x

    avgm = jnp.mean(out1, axis=1, keepdims=True)
    maxm = jnp.max(out1, axis=1, keepdims=True)
    inp = jnp.concatenate([avgm, maxm], axis=1)
    conv = lax.conv_general_dilated(
        inp, wconv, window_strides=(1, 1, 1),
        padding=[(0, 0), (3, 3), (3, 3)],
        dimension_numbers=("NCDHW", "OIDHW", "NCDHW"))
    sa = jax.nn.sigmoid(conv + bconv.reshape(1, 1, 1, 1, 1))
    return sa * out1


if __name__ == "__main__":
    key = jax.random.PRNGKey(0)
    N, C, D, H, W = 2, 16, 4, 16, 16
    reduction = 8
    mid = C // reduction

    ks = jax.random.split(key, 7)
    x = jax.random.normal(ks[0], (N, C, D, H, W), dtype=jnp.float32)
    # Deterministic synthetic parameters (shapes follow the PyTorch module's __init__).
    w1 = 0.3 * jax.random.normal(ks[1], (mid, C), dtype=jnp.float32)   # Linear(C -> C//8).weight
    b1 = 0.1 * jax.random.normal(ks[2], (mid,), dtype=jnp.float32)
    w2 = 0.3 * jax.random.normal(ks[3], (C, mid), dtype=jnp.float32)   # Linear(C//8 -> C).weight
    b2 = 0.1 * jax.random.normal(ks[4], (C,), dtype=jnp.float32)
    wconv = 0.1 * jax.random.normal(ks[5], (1, 2, 1, 7, 7), dtype=jnp.float32)  # Conv3d(2,1,(1,7,7))
    bconv = 0.1 * jax.random.normal(ks[6], (1,), dtype=jnp.float32)

    # Banded conv matrix built once per weight set and reused across calls.
    kk = build_spatial_conv_matrix(wconv, H, W)

    out = cbam_forward(x, w1, b1, w2, b2, wconv, bconv, kk)
    out = jax.block_until_ready(out)
    assert out.shape == (N, C, D, H, W)

    ref = jax.block_until_ready(cbam_reference(x, w1, b1, w2, b2, wconv, bconv))
    max_err = float(jnp.max(jnp.abs(out - ref)))
    if max_err > 1e-3:
        raise RuntimeError(f"mismatch vs reference: max_abs_err={max_err}")

    print("KERNEL_OK")
</pallas_src>

<mosaic_0001>
module attributes {stable_mosaic.version = 11 : i64} {
  func.func @_cbam_kernel(%arg0: i32, %arg1: memref<1x16x1024xf32, #tpu.memory_space<vmem>>, %arg2: memref<2x16xf32, #tpu.memory_space<vmem>>, %arg3: memref<2x1xf32, #tpu.memory_space<vmem>>, %arg4: memref<16x2xf32, #tpu.memory_space<vmem>>, %arg5: memref<16x1xf32, #tpu.memory_space<vmem>>, %arg6: memref<512x256xf32, #tpu.memory_space<vmem>>, %arg7: memref<1xf32, #tpu.memory_space<smem>>, %arg8: memref<1x16x1024xf32, #tpu.memory_space<vmem>>, %arg9: memref<4x512xf32, #tpu.memory_space<vmem>>) attributes {dimension_semantics = [#tpu.dimension_semantics<parallel>], iteration_bounds = array<i64: 2>, scalar_prefetch = 0 : i64, scratch_operands = 1 : i64, tpu.core_type = #tpu.core_type<tc>, window_params = [{transform_indices = @transform_0, window_bounds = array<i64: 1, 16, 1024>}, {pipeline_mode = #tpu.pipeline_mode<synchronous>, transform_indices = @transform_1, window_bounds = array<i64: 2, 16>}, {pipeline_mode = #tpu.pipeline_mode<synchronous>, transform_indices = @transform_2, window_bounds = array<i64: 2, 1>}, {pipeline_mode = #tpu.pipeline_mode<synchronous>, transform_indices = @transform_3, window_bounds = array<i64: 16, 2>}, {pipeline_mode = #tpu.pipeline_mode<synchronous>, transform_indices = @transform_4, window_bounds = array<i64: 16, 1>}, {pipeline_mode = #tpu.pipeline_mode<synchronous>, transform_indices = @transform_5, window_bounds = array<i64: 512, 256>}, {transform_indices = @transform_6, window_bounds = array<i64: 1>}, {transform_indices = @transform_7, window_bounds = array<i64: 1, 16, 1024>}]} {
    %c0 = arith.constant 0 : index
    %c0_0 = arith.constant 0 : index
    %c0_1 = arith.constant 0 : index
    %0 = vector.load %arg1[%c0, %c0_0, %c0_1] : memref<1x16x1024xf32, #tpu.memory_space<vmem>>, vector<1x16x1024xf32>
    %1 = vector.shape_cast %0 : vector<1x16x1024xf32> to vector<16x1024xf32>
    %cst = arith.constant dense<0.000000e+00> : vector<16xf32>
    %2 = vector.multi_reduction <add>, %1, %cst [1] : vector<16x1024xf32> to vector<16xf32>
    %3 = vector.shape_cast %2 : vector<16xf32> to vector<16x1xf32>
    %cst_2 = arith.constant dense<0xFF800000> : vector<16xf32>
    %4 = vector.multi_reduction <maximumf>, %1, %cst_2 [1] : vector<16x1024xf32> to vector<16xf32>
    %5 = vector.shape_cast %4 : vector<16xf32> to vector<16x1xf32>
    %6 = tpu.iota {dimensions = array<i32: 1>} : vector<16x2xi32>
    %c0_i32 = arith.constant 0 : i32
    %7 = vector.broadcast %c0_i32 : i32 to vector<16x2xi32>
    %8 = arith.cmpi eq, %6, %7 : vector<16x2xi32>
    %cst_3 = arith.constant 9.765625E-4 : f32
    %9 = vector.broadcast %cst_3 : f32 to vector<16x1xf32>
    %10 = arith.mulf %3, %9 : vector<16x1xf32>
    %11 = vector.shape_cast %10 : vector<16x1xf32> to vector<16x1xf32>
    %12 = vector.broadcast %11 : vector<16x1xf32> to vector<16x2xf32>
    %13 = vector.shape_cast %5 : vector<16x1xf32> to vector<16x1xf32>
    %14 = vector.broadcast %13 : vector<16x1xf32> to vector<16x2xf32>
    %15 = arith.select %8, %12, %14 : vector<16x2xi1>, vector<16x2xf32>
    %c0_4 = arith.constant 0 : index
    %c0_5 = arith.constant 0 : index
    %16 = vector.load %arg2[%c0_4, %c0_5] : memref<2x16xf32, #tpu.memory_space<vmem>>, vector<2x16xf32>
    %cst_6 = arith.constant dense<0.000000e+00> : vector<2x2xf32>
    %17 = tpu.matmul %16, %15, %cst_6 {dimension_numbers = #tpu.dot_dimension_numbers<[1], [0], [0], [1], [0, 0, 1, 1], [], []>} : vector<2x16xf32>, vector<16x2xf32>, vector<2x2xf32> -> vector<2x2xf32>
    %c0_7 = arith.constant 0 : index
    %c0_8 = arith.constant 0 : index
    %18 = vector.load %arg3[%c0_7, %c0_8] : memref<2x1xf32, #tpu.memory_space<vmem>>, vector<2x1xf32>
    %19 = vector.broadcast %18 : vector<2x1xf32> to vector<2x2xf32>
    %20 = arith.addf %17, %19 : vector<2x2xf32>
    %cst_9 = arith.constant 0.000000e+00 : f32
    %21 = vector.broadcast %cst_9 : f32 to vector<2x2xf32>
    %22 = arith.maximumf %20, %21 : vector<2x2xf32>
    %c0_10 = arith.constant 0 : index
    %c0_11 = arith.constant 0 : index
    %23 = vector.load %arg4[%c0_10, %c0_11] : memref<16x2xf32, #tpu.memory_space<vmem>>, vector<16x2xf32>
    %cst_12 = arith.constant dense<0.000000e+00> : vector<16x2xf32>
    %24 = tpu.matmul %23, %22, %cst_12 {dimension_numbers = #tpu.dot_dimension_numbers<[1], [0], [0], [1], [0, 0, 1, 1], [], []>} : vector<16x2xf32>, vector<2x2xf32>, vector<16x2xf32> -> vector<16x2xf32>
    %c0_13 = arith.constant 0 : index
    %c0_14 = arith.constant 0 : index
    %25 = vector.load %arg5[%c0_13, %c0_14] : memref<16x1xf32, #tpu.memory_space<vmem>>, vector<16x1xf32>
    %26 = vector.broadcast %25 : vector<16x1xf32> to vector<16x2xf32>
    %27 = arith.addf %24, %26 : vector<16x2xf32>
    %cst_15 = arith.constant dense<0.000000e+00> : vector<16xf32>
    %28 = vector.multi_reduction <add>, %27, %cst_15 [1] : vector<16x2xf32> to vector<16xf32>
    %29 = vector.shape_cast %28 : vector<16xf32> to vector<16x1xf32>
    %30 = arith.negf %29 : vector<16x1xf32>
    %31 = math.exp %30 : vector<16x1xf32>
    %cst_16 = arith.constant 1.000000e+00 : f32
    %32 = vector.broadcast %cst_16 : f32 to vector<16x1xf32>
    %33 = arith.addf %32, %31 : vector<16x1xf32>
    %34 = arith.divf %32, %33 : vector<16x1xf32>
    %35 = vector.broadcast %34 : vector<16x1xf32> to vector<16x1024xf32>
    %36 = arith.mulf %1, %35 : vector<16x1024xf32>
    %cst_17 = arith.constant 6.250000e-02 : f32
    %37 = vector.broadcast %cst_17 : f32 to vector<1x16xf32>
    %cst_18 = arith.constant dense<0.000000e+00> : vector<1x1024xf32>
    %38 = tpu.matmul %37, %36, %cst_18 {dimension_numbers = #tpu.dot_dimension_numbers<[1], [0], [0], [1], [0, 0, 1, 1], [], []>} : vector<1x16xf32>, vector<16x1024xf32>, vector<1x1024xf32> -> vector<1x1024xf32>
    %cst_19 = arith.constant dense<0xFF800000> : vector<1024xf32>
    %39 = vector.multi_reduction <maximumf>, %36, %cst_19 [0] : vector<16x1024xf32> to vector<1024xf32>
    %40 = vector.shape_cast %39 : vector<1024xf32> to vector<1x1024xf32>
    %41 = vector.extract_strided_slice %38 {offsets = [0, 0], sizes = [1, 256], strides = [1, 1]} : vector<1x1024xf32> to vector<1x256xf32>
    %c0_20 = arith.constant 0 : index
    %c0_21 = arith.constant 0 : index
    %42 = vector.load %arg9[%c0_20, %c0_21] : memref<4x512xf32, #tpu.memory_space<vmem>>, vector<1x256xf32>
    tpu.vector_store %arg9[%c0_20, %c0_21], %41 {strides = array<i32>} : memref<4x512xf32, #tpu.memory_space<vmem>>, vector<1x256xf32>,
    %43 = vector.extract_strided_slice %40 {offsets = [0, 0], sizes = [1, 256], strides = [1, 1]} : vector<1x1024xf32> to vector<1x256xf32>
    %c0_22 = arith.constant 0 : index
    %c256 = arith.constant 256 : index
    %44 = vector.load %arg9[%c0_22, %c256] : memref<4x512xf32, #tpu.memory_space<vmem>>, vector<1x256xf32>
    tpu.vector_store %arg9[%c0_22, %c256], %43 {strides = array<i32>} : memref<4x512xf32, #tpu.memory_space<vmem>>, vector<1x256xf32>,
    %45 = vector.extract_strided_slice %38 {offsets = [0, 256], sizes = [1, 256], strides = [1, 1]} : vector<1x1024xf32> to vector<1x256xf32>
    %c1 = arith.constant 1 : index
    %c0_23 = arith.constant 0 : index
    %46 = vector.load %arg9[%c1, %c0_23] : memref<4x512xf32, #tpu.memory_space<vmem>>, vector<1x256xf32>
    tpu.vector_store %arg9[%c1, %c0_23], %45 {strides = array<i32>} : memref<4x512xf32, #tpu.memory_space<vmem>>, vector<1x256xf32>,
    %47 = vector.extract_strided_slice %40 {offsets = [0, 256], sizes = [1, 256], strides = [1, 1]} : vector<1x1024xf32> to vector<1x256xf32>
    %c1_24 = arith.constant 1 : index
    %c256_25 = arith.constant 256 : index
    %48 = vector.load %arg9[%c1_24, %c256_25] : memref<4x512xf32, #tpu.memory_space<vmem>>, vector<1x256xf32>
    tpu.vector_store %arg9[%c1_24, %c256_25], %47 {strides = array<i32>} : memref<4x512xf32, #tpu.memory_space<vmem>>, vector<1x256xf32>,
    %49 = vector.extract_strided_slice %38 {offsets = [0, 512], sizes = [1, 256], strides = [1, 1]} : vector<1x1024xf32> to vector<1x256xf32>
    %c2 = arith.constant 2 : index
    %c0_26 = arith.constant 0 : index
    %50 = vector.load %arg9[%c2, %c0_26] : memref<4x512xf32, #tpu.memory_space<vmem>>, vector<1x256xf32>
    tpu.vector_store %arg9[%c2, %c0_26], %49 {strides = array<i32>} : memref<4x512xf32, #tpu.memory_space<vmem>>, vector<1x256xf32>,
    %51 = vector.extract_strided_slice %40 {offsets = [0, 512], sizes = [1, 256], strides = [1, 1]} : vector<1x1024xf32> to vector<1x256xf32>
    %c2_27 = arith.constant 2 : index
    %c256_28 = arith.constant 256 : index
    %52 = vector.load %arg9[%c2_27, %c256_28] : memref<4x512xf32, #tpu.memory_space<vmem>>, vector<1x256xf32>
    tpu.vector_store %arg9[%c2_27, %c256_28], %51 {strides = array<i32>} : memref<4x512xf32, #tpu.memory_space<vmem>>, vector<1x256xf32>,
    %53 = vector.extract_strided_slice %38 {offsets = [0, 768], sizes = [1, 256], strides = [1, 1]} : vector<1x1024xf32> to vector<1x256xf32>
    %c3 = arith.constant 3 : index
    %c0_29 = arith.constant 0 : index
    %54 = vector.load %arg9[%c3, %c0_29] : memref<4x512xf32, #tpu.memory_space<vmem>>, vector<1x256xf32>
    tpu.vector_store %arg9[%c3, %c0_29], %53 {strides = array<i32>} : memref<4x512xf32, #tpu.memory_space<vmem>>, vector<1x256xf32>,
    %55 = vector.extract_strided_slice %40 {offsets = [0, 768], sizes = [1, 256], strides = [1, 1]} : vector<1x1024xf32> to vector<1x256xf32>
    %c3_30 = arith.constant 3 : index
    %c256_31 = arith.constant 256 : index
    %56 = vector.load %arg9[%c3_30, %c256_31] : memref<4x512xf32, #tpu.memory_space<vmem>>, vector<1x256xf32>
    tpu.vector_store %arg9[%c3_30, %c256_31], %55 {strides = array<i32>} : memref<4x512xf32, #tpu.memory_space<vmem>>, vector<1x256xf32>,
    %c0_32 = arith.constant 0 : index
    %c0_33 = arith.constant 0 : index
    %57 = vector.load %arg9[%c0_32, %c0_33] : memref<4x512xf32, #tpu.memory_space<vmem>>, vector<4x512xf32>
    %c0_34 = arith.constant 0 : index
    %c0_35 = arith.constant 0 : index
    %58 = vector.load %arg6[%c0_34, %c0_35] : memref<512x256xf32, #tpu.memory_space<vmem>>, vector<512x256xf32>
    %cst_36 = arith.constant dense<0.000000e+00> : vector<4x256xf32>
    %59 = tpu.matmul %57, %58, %cst_36 {dimension_numbers = #tpu.dot_dimension_numbers<[1], [0], [0], [1], [0, 0, 1, 1], [], []>} : vector<4x512xf32>, vector<512x256xf32>, vector<4x256xf32> -> vector<4x256xf32>
    %c0_37 = arith.constant 0 : index
    %60 = memref.load %arg7[%c0_37] : memref<1xf32, #tpu.memory_space<smem>>
    %61 = vector.broadcast %60 : f32 to vector<4x256xf32>
    %62 = arith.addf %59, %61 : vector<4x256xf32>
    %63 = arith.negf %62 : vector<4x256xf32>
    %64 = math.exp %63 : vector<4x256xf32>
    %cst_38 = arith.constant 1.000000e+00 : f32
    %65 = vector.broadcast %cst_38 : f32 to vector<4x256xf32>
    %66 = arith.addf %65, %64 : vector<4x256xf32>
    %67 = arith.divf %65, %66 : vector<4x256xf32>
    %68 = vector.extract_strided_slice %36 {offsets = [0, 0], sizes = [16, 256], strides = [1, 1]} : vector<16x1024xf32> to vector<16x256xf32>
    %69 = vector.extract_strided_slice %67 {offsets = [0, 0], sizes = [1, 256], strides = [1, 1]} : vector<4x256xf32> to vector<1x256xf32>
    %70 = vector.broadcast %69 : vector<1x256xf32> to vector<16x256xf32>
    %71 = arith.mulf %68, %70 : vector<16x256xf32>
    %c0_39 = arith.constant 0 : index
    %c0_40 = arith.constant 0 : index
    %c0_41 = arith.constant 0 : index
    %72 = vector.load %arg8[%c0_39, %c0_40, %c0_41] : memref<1x16x1024xf32, #tpu.memory_space<vmem>>, vector<1x16x256xf32>
    %73 = vector.shape_cast %72 : vector<1x16x256xf32> to vector<16x256xf32>
    %74 = vector.shape_cast %71 : vector<16x256xf32> to vector<1x16x256xf32>
    tpu.vector_store %arg8[%c0_39, %c0_40, %c0_41], %74 {strides = array<i32>} : memref<1x16x1024xf32, #tpu.memory_space<vmem>>, vector<1x16x256xf32>,
    %75 = vector.extract_strided_slice %36 {offsets = [0, 256], sizes = [16, 256], strides = [1, 1]} : vector<16x1024xf32> to vector<16x256xf32>
    %76 = vector.extract_strided_slice %67 {offsets = [1, 0], sizes = [1, 256], strides = [1, 1]} : vector<4x256xf32> to vector<1x256xf32>
    %77 = vector.broadcast %76 : vector<1x256xf32> to vector<16x256xf32>
    %78 = arith.mulf %75, %77 : vector<16x256xf32>
    %c0_42 = arith.constant 0 : index
    %c0_43 = arith.constant 0 : index
    %c256_44 = arith.constant 256 : index
    %79 = vector.load %arg8[%c0_42, %c0_43, %c256_44] : memref<1x16x1024xf32, #tpu.memory_space<vmem>>, vector<1x16x256xf32>
    %80 = vector.shape_cast %79 : vector<1x16x256xf32> to vector<16x256xf32>
    %81 = vector.shape_cast %78 : vector<16x256xf32> to vector<1x16x256xf32>
    tpu.vector_store %arg8[%c0_42, %c0_43, %c256_44], %81 {strides = array<i32>} : memref<1x16x1024xf32, #tpu.memory_space<vmem>>, vector<1x16x256xf32>,
    %82 = vector.extract_strided_slice %36 {offsets = [0, 512], sizes = [16, 256], strides = [1, 1]} : vector<16x1024xf32> to vector<16x256xf32>
    %83 = vector.extract_strided_slice %67 {offsets = [2, 0], sizes = [1, 256], strides = [1, 1]} : vector<4x256xf32> to vector<1x256xf32>
    %84 = vector.broadcast %83 : vector<1x256xf32> to vector<16x256xf32>
    %85 = arith.mulf %82, %84 : vector<16x256xf32>
    %c0_45 = arith.constant 0 : index
    %c0_46 = arith.constant 0 : index
    %c512 = arith.constant 512 : index
    %86 = vector.load %arg8[%c0_45, %c0_46, %c512] : memref<1x16x1024xf32, #tpu.memory_space<vmem>>, vector<1x16x256xf32>
    %87 = vector.shape_cast %86 : vector<1x16x256xf32> to vector<16x256xf32>
    %88 = vector.shape_cast %85 : vector<16x256xf32> to vector<1x16x256xf32>
    tpu.vector_store %arg8[%c0_45, %c0_46, %c512], %88 {strides = array<i32>} : memref<1x16x1024xf32, #tpu.memory_space<vmem>>, vector<1x16x256xf32>,
    %89 = vector.extract_strided_slice %36 {offsets = [0, 768], sizes = [16, 256], strides = [1, 1]} : vector<16x1024xf32> to vector<16x256xf32>
    %90 = vector.extract_strided_slice %67 {offsets = [3, 0], sizes = [1, 256], strides = [1, 1]} : vector<4x256xf32> to vector<1x256xf32>
    %91 = vector.broadcast %90 : vector<1x256xf32> to vector<16x256xf32>
    %92 = arith.mulf %89, %91 : vector<16x256xf32>
    %c0_47 = arith.constant 0 : index
    %c0_48 = arith.constant 0 : index
    %c768 = arith.constant 768 : index
    %93 = vector.load %arg8[%c0_47, %c0_48, %c768] : memref<1x16x1024xf32, #tpu.memory_space<vmem>>, vector<1x16x256xf32>
    %94 = vector.shape_cast %93 : vector<1x16x256xf32> to vector<16x256xf32>
    %95 = vector.shape_cast %92 : vector<16x256xf32> to vector<1x16x256xf32>
    tpu.vector_store %arg8[%c0_47, %c0_48, %c768], %95 {strides = array<i32>} : memref<1x16x1024xf32, #tpu.memory_space<vmem>>, vector<1x16x256xf32>,
    return
  }
  func.func @transform_0(%arg0: i32) -> (i32, i32, i32) {
    %c0_i32 = arith.constant 0 : i32
    %c0_i32_0 = arith.constant 0 : i32
    %c0_i32_1 = arith.constant 0 : i32
    return %arg0, %c0_i32, %c0_i32_0 : i32, i32, i32
  }
  func.func @transform_1(%arg0: i32) -> (i32, i32) {
    %c0_i32 = arith.constant 0 : i32
    %c0_i32_0 = arith.constant 0 : i32
    %c0_i32_1 = arith.constant 0 : i32
    return %c0_i32, %c0_i32_0 : i32, i32
  }
  func.func @transform_2(%arg0: i32) -> (i32, i32) {
    %c0_i32 = arith.constant 0 : i32
    %c0_i32_0 = arith.constant 0 : i32
    %c0_i32_1 = arith.constant 0 : i32
    return %c0_i32, %c0_i32_0 : i32, i32
  }
  func.func @transform_3(%arg0: i32) -> (i32, i32) {
    %c0_i32 = arith.constant 0 : i32
    %c0_i32_0 = arith.constant 0 : i32
    %c0_i32_1 = arith.constant 0 : i32
    return %c0_i32, %c0_i32_0 : i32, i32
  }
  func.func @transform_4(%arg0: i32) -> (i32, i32) {
    %c0_i32 = arith.constant 0 : i32
    %c0_i32_0 = arith.constant 0 : i32
    %c0_i32_1 = arith.constant 0 : i32
    return %c0_i32, %c0_i32_0 : i32, i32
  }
  func.func @transform_5(%arg0: i32) -> (i32, i32) {
    %c0_i32 = arith.constant 0 : i32
    %c0_i32_0 = arith.constant 0 : i32
    %c0_i32_1 = arith.constant 0 : i32
    return %c0_i32, %c0_i32_0 : i32, i32
  }
  func.func @transform_6(%arg0: i32) -> i32 {
    %c0_i32 = arith.constant 0 : i32
    %c0_i32_0 = arith.constant 0 : i32
    return %c0_i32 : i32
  }
  func.func @transform_7(%arg0: i32) -> (i32, i32, i32) {
    %c0_i32 = arith.constant 0 : i32
    %c0_i32_0 = arith.constant 0 : i32
    %c0_i32_1 = arith.constant 0 : i32
    return %arg0, %c0_i32, %c0_i32_0 : i32, i32, i32
  }
}

</mosaic_0001>

<bundles_post_ra>
// kernel: tpu_custom_call.1
= control target key start
LH: loop header
LB: loop body
LE: loop exit
PB: predicated region body
PF: predicated region fallthrough
CT: control target
= control target key end

     0   :  { %s2332_s0 = inlined_call_operand.hbm [shape: f32[2,16,1024], index: 0, kind: input, shape index: {}]   ;;  %s2333_s1 = inlined_call_operand.vmem [shape: f32[2,16], index: 1, kind: input, shape index: {}]   ;;  %s2334_s2 = inlined_call_operand.vmem [shape: f32[2,1], index: 2, kind: input, shape index: {}]   ;;  %s2335_s3 = inlined_call_operand.vmem [shape: f32[16,2], index: 3, kind: input, shape index: {}]   ;;  %s2336_s4 = inlined_call_operand.vmem [shape: f32[16,1], index: 4, kind: input, shape index: {}]   ;;  %s2337_s5 = inlined_call_operand.hbm [shape: f32[512,256], index: 5, kind: input, shape index: {}]   ;;  %s2338_s6 = inlined_call_operand.<no memory space> [shape: f32[1], index: 6, kind: input, shape index: {}]   ;;  %s2339_s7 = inlined_call_operand.hbm [shape: f32[2,16,1024], index: 7, kind: output, shape index: {}]  }
   0x1   :  { %12 = sst [smem:[#allocation3]] %s2338_s6 }
   0x2   :  { %13 = vsyncpa [#allocation5], 0 }
   0x3   :  { %15 = vsyncpa [#allocation5 + $0x1], 0 }
   0x4   :  { %16 = vsyncpa [#allocation8], 0 }
   0x5   :  { %17 = vsyncpa [#allocation6], 0 }
   0x6   :  { %19 = vsyncpa [#allocation6 + $0x1], 0  ;;  %s1864_s26 = smov 0   ;;  %s1866_s27 = smov 0  }
   0x7   :  { %s1868_s28 = smov 0   ;;  %s1870_s29 = smov 0  }
   0x8 LB: > { %s1885_s6 = sadd.s32 4294967295, %s1805_s29   ;;  %s1547_s30 = sadd.s32 4294967294, %s1805_s29   ;;  %s1805_s29 = sphi %s1870_s29, %s2363_s29   ;;  %s1801_s28 = sphi %s1868_s28, %s2362_s28   ;;  %s1797_s27 = sphi %s1866_s27, %s2361_s27   ;;  %s1793_s26 = sphi %s1864_s26, %s2360_s26  }
   0x9   : > { %p45_p0 = scmp.ne.s32.totalorder %s1797_s27, %s1793_s26  ;;  %p2340_p1 = scmp.eq.s32.totalorder %s1885_s6, 0 }
   0xa   : > { %p201_p3 = scmp.eq.s32.totalorder %s1547_s30, 1  ;;  %p1548_p5 = scmp.ge.s32.totalorder %s1805_s29, 1 }
   0xb   : > { %p1894_p4 = por %p2340_p1, %p45_p0  ;;  %p208_p7 = scmp.lt.s32.totalorder %s1805_s29, 3 }
   0xc   : > { %p1899_p6 = por %p201_p3, %p45_p0  ;;  %s1807_s11 = smov [#allocation7]  }
   0xd   : > { %s2344_s8 = scalar_select %p1894_p4, 1, 0 }
   0xe   : > { %s2345_s9 = scalar_select %p1899_p6, 1, 0 }
   0xf   : > { %p1904_p8 = pnand %p1548_p5, %p208_p7  ;;  %s232_s12 = sshll.u32 %s1807_s11, 4  ;;  %s233_s12 = int_to_ptr.vmem [resolvable:$true] %s232_s12 }
  0x10   : > { %s1918_s14 = sadd.s32 1, %s1805_s29   ;;  %s32_s15 = sadd.s32 1, %s1801_s28 }
  0x11   : > { %s2346_s10 = scalar_select %p1904_p8, 1, 0 }
  0x12   : > { %p1603_p9 = pneg %p1904_p8  ;;  %s29_s16 = ssub.s32 %s1805_s29, %s1918_s14 }
  0x13   : > { %s1694_s17 = scalar_lea.vmem %s233_s12, 16384  ;;  %p1702_p5 = scmp.lt.s32.totalorder %s233_s12, %s233_s12 }
  0x14   : > { %p1913_p11 = pnand %p1603_p9, %p2340_p1  ;;  %p1695_p13 = scmp.ne.s32.totalorder %s233_s12, %s1694_s17 }
  0x15   : > { %p1703_p7 = scmp.lt.s32.totalorder %s1694_s17, %s1694_s17 }
  0x16   : > { %p1685_p12 = pneg %p1913_p11 }
  0x17   : > { %p1704_p10 = por %p1703_p7, %p1702_p5 }
  0x18   : > { %p1697_p0 = pnand %p1695_p13, %p1685_p12 }
  0x1a   : > { %p1698_p3 = pneg %p1697_p0 }
  0x1c   : > { %p1705_p2 = pnand %p1704_p10, %p1698_p3 }
  0x1e   : > { %1708 = shalt.err (!%p1705_p2)
}
  0x1f   : > { %s1808_s18 = smov 256   ;;  %s1809_s19 = smov 16  }
  0x20   : > { %1606 = dma.hbm_to_vmem [thread:$0]  (!%p1913_p11), %s2337_s5, 16384, %s233_s12, [#allocation8], %s1808_s18, %s1808_s18, %s1809_s19  }
  0x21   : > { %p30_p9 = scmp.eq.s32.totalorder %s29_s16, 0  ;;  %p39_p12 = scmp.ne.s32.totalorder %s1801_s28, %s1797_s27 }
  0x22   : > { %p40_p10 = scmp.eq.s32.totalorder %s1805_s29, 0  ;;  %p1616_p2 = scmp.lt.s32.totalorder %s1805_s29, 2 }
  0x23   : > { %s1935_s22 = scalar_select %p30_p9, %s1801_s28, %s32_s15  }
  0x24   : > { %p41_p13 = por %p40_p10, %p39_p12  ;;  %p2348_p0 = scmp.eq.s32.totalorder %s1885_s6, 1 }
  0x25   : > { %s249_s24 = sand.u32 1, %s1801_s28   ;;  %s1575_s25 = sshll.u32 %s1805_s29, 11 }
  0x26   : > { %p1939_p3 = por %p2348_p0, %p39_p12  ;;  %s1551_s30 = sshll.u32 %s249_s24, 7 }
  0x27   : > { %s1948_s17 = scalar_lea.hbm %s2332_s0, %s1575_s25  ;;  %s253_s12 = scalar_lea.vmem [#allocation4], %s1551_s30 }
  0x28   : > { %s2349_s23 = scalar_select %p1939_p3, 1, 0 }
  0x29   : > { %s260_s15 = sshll.u32 %s253_s12, 4  ;;  %p1950_p11 = pnand %p1616_p2, %p41_p13  ;;  %s1954_s15 = int_to_ptr.vmem [resolvable:$true] %s260_s15 }
  0x2a   : > { %s1956_s18 = scalar_lea.sflag [#allocation5], %s249_s24  ;;  %s1709_s19 = scalar_lea.hbm %s1948_s17, 2048 }
  0x2b   : > { %p1710_p5 = scmp.ne.s32.totalorder %s1948_s17, %s1709_s19  ;;  %p1711_p7 = pneg %p1950_p11 }
  0x2c   : > { %s1714_s25 = scalar_lea.hbm %s2332_s0, 4096  ;;  %p1715_p10 = scmp.lt.s32.totalorder %s1948_s17, %s2332_s0 }
  0x2d   : > { %p1712_p9 = pnand %p1711_p7, %p1710_p5  ;;  %p1716_p2 = scmp.lt.s32.totalorder %s1714_s25, %s1709_s19 }
  0x2f   : > { %p1713_p12 = pneg %p1712_p9  ;;  %p1717_p13 = por %p1716_p2, %p1715_p10 }
  0x31   : > { %p1718_p0 = pnand %p1717_p13, %p1713_p12 }
  0x33   : > { %1721 = shalt.err (!%p1718_p0)
}
  0x34   : > { %s1722_s24 = scalar_lea.vmem %s1954_s15, 2048  ;;  %s1810_s13 = smov [#allocation4]  }
  0x35   : > { %p1723_p1 = scmp.ne.s32.totalorder %s1954_s15, %s1722_s24  ;;  %s1727_s12 = sshll.u32 %s1810_s13, 4  ;;  %s1728_s12 = int_to_ptr.vmem [resolvable:$false] %s1727_s12 }
  0x36   : > { %s1729_s20 = scalar_lea.vmem %s1728_s12, 4096  ;;  %p1730_p9 = scmp.lt.s32.totalorder %s1954_s15, %s1728_s12 }
  0x37   : > { %p1725_p6 = pnand %p1723_p1, %p1711_p7  ;;  %p1731_p3 = scmp.lt.s32.totalorder %s1729_s20, %s1722_s24 }
  0x39   : > { %p1726_p5 = pneg %p1725_p6  ;;  %p1732_p4 = por %p1731_p3, %p1730_p9 }
  0x3b   : > { %p1733_p8 = pnand %p1732_p4, %p1726_p5 }
  0x3d   : > { %1736 = shalt.err (!%p1733_p8)
}
  0x3e   : > { %s1811_s19 = smov 1024   ;;  %s1812_s21 = smov 64  }
  0x3f   : > { %1610 = dma.hbm_to_vmem [thread:$0]  (!%p1950_p11), %s1948_s17, 2048, %s1954_s15, %s1956_s18, %s1811_s19, %s1811_s19, %s1812_s21  }
  0x40   : > { %p2351_p1 = scmp.ne.s32.totalorder %s2346_s10, 0 }
  0x41   : > { %s1980_s25 = sand.u32 (!%p2351_p1), 1, %s1797_s27   ;;  %p2352_p4 = scmp.ne.s32.totalorder (!%p2351_p1), %s2344_s8, 0 }
  0x42   : > { %272 = sbr.rel (%p2351_p1) target bundleno = 1279 (0x4ff), region = 48  ;;  %s1555_s30 = sshll.u32 (!%p2351_p1), %s1980_s25, 7 }
  0x43   : > { %s275_s11 = scalar_lea.sflag (!%p2351_p1), [#allocation5], %s1980_s25  ;;  %s1986_s24 = scalar_lea.vmem (!%p2351_p1), [#allocation4], %s1555_s30 }
  0x47   : > { %1780 = dma.done.wait (%p2352_p4), %s275_s11, 2048  }
  0x48   : > { %1782 = vsyncadd (%p2352_p4), %s275_s11, 4294965248  ;;  %p2353_p6 = scmp.eq.s32.totalorder %s1885_s6, 0 }
  0x4a   : > { %1784 = dma.done.wait (%p2353_p6), [#allocation8], 16384   ;;  %p2354_p8 = pmov %p2353_p6 }
  0x4b   : > { %v1997_v0 = vld [vmem:[%s1986_s24 + $0x40] sm:$0xff]  ;;  %v2000_v1 = vld [vmem:[%s1986_s24 + $0x48] sm:$0xff]  ;;  %v2003_v2 = vld [vmem:[%s1986_s24 + $0x50] sm:$0xff]  ;;  %v1813_v44 = vmov 0.0   ;;  %vm1814_vm0 = vmmov 0   ;;  %v1815_v45 = vmov 0   ;;  %v365_v47 = vlaneseq }
  0x4c   : > { %1786 = vsyncadd (%p2354_p8), [#allocation8], 4294950912  ;;  %v2006_v3 = vld [vmem:[%s1986_s24 + $0x58] sm:$0xff]  ;;  %v2009_v4 = vld [vmem:[%s1986_s24 + $0x60] sm:$0xff]  ;;  %v338_v5 = vadd.f32 %v2000_v1, %v1997_v0  ;;  %v356_v6 = vmax.f32 %v1997_v0, %v2003_v2  ;;  %1583 = vmatprep.subr.mxu0 %v1813_v44  ;;  %1587 = vmatprep.mubr.msk.f32.mxu0 %vm1814_vm0, %v1813_v44  ;;  %vm379_vm2 = vcmask 130048   ;;  %vm468_vm3 = vcmask 15360  }
  0x4d   : > { %v2016_v7 = vld [vmem:[%s1986_s24 + $0x68] sm:$0xff]  ;;  %v2019_v8 = vld [vmem:[%s1986_s24 + $0x78] sm:$0xff]  ;;  %v357_v9 = vmax.f32 %v2000_v1, %v2006_v3  ;;  %v2024_v10 = vld [vmem:[%s1986_s24] sm:$0xff]  ;;  %1663 = vset.pattern.permute.xlu0 %v1815_v45  ;;  %1664 = vset.pattern.permute.xlu1 %v1815_v45  ;;  %v366_v48 = vand.u32 127, %v365_v47  ;;  %vm475_vm4 = vcmask 1041408   ;;  %vm2202_vm5 = vcmp.lt.s32.totalorder %v365_v47, 256 }
  0x4e   : > { %v339_v11 = vadd.f32 %v338_v5, %v2003_v2  ;;  %v358_v12 = vmax.f32 %v356_v6, %v2009_v4  ;;  %v2029_v13 = vld [vmem:[%s1986_s24 + $0x8] sm:$0xff]  ;;  %v2032_v14 = vld [vmem:[%s1986_s24 + $0x10] sm:$0xff]  ;;  %v2035_v15 = vld [vmem:[%s1986_s24 + $0x18] sm:$0xff]  ;;  %s1576_s8 = sshll.u32 %s1885_s6, 11  ;;  %s2257_s10 = scalar_lea.vmem [#allocation9], %s1555_s30 }
  0x4f   : > { %v2038_v16 = vld [vmem:[%s1986_s24 + $0x70] sm:$0xff]  ;;  %v359_v17 = vmax.f32 %v357_v9, %v2016_v7  ;;  %v329_v18 = vadd.f32 %v2029_v13, %v2024_v10  ;;  %v347_v19 = vmax.f32 %v2024_v10, %v2032_v14  ;;  %v348_v20 = vmax.f32 %v2029_v13, %v2035_v15  ;;  %v2050_v23 = vld [vmem:[%s1986_s24 + $0x20] sm:$0xff]  ;;  %v2053_v24 = vld [vmem:[%s1986_s24 + $0x28] sm:$0xff]  ;;  %s1464_s17 = sshll.u32 %s2257_s10, 4  ;;  %s2275_s15 = scalar_lea.hbm %s2339_s7, %s1576_s8  ;;  %s2277_s17 = int_to_ptr.vmem [resolvable:$true] %s1464_s17 }
  0x50   : > { %v340_v21 = vadd.f32 %v339_v11, %v2006_v3  ;;  %v360_v22 = vmax.f32 %v358_v12, %v2038_v16  ;;  %v2056_v25 = vld [vmem:[%s1986_s24 + $0x38] sm:$0xff]  ;;  %v2064_v31 = vld [vmem:[%s1986_s24 + $0x30] sm:$0xff]  ;;  %vm367_vm1 = vcmp.eq.s32.totalorder %v366_v48, 0  ;;  %s1224_s24 = sld [smem:[#allocation3]]  ;;  %s1451_s16 = scalar_lea.sflag [#allocation6], %s1980_s25 }
  0x51   : > { %v361_v26 = vmax.f32 %v359_v17, %v2019_v8  ;;  %v330_v27 = vadd.f32 %v329_v18, %v2032_v14  ;;  %v349_v28 = vmax.f32 %v347_v19, %v2050_v23  ;;  %v350_v29 = vmax.f32 %v348_v20, %v2053_v24  ;;  %v373_v46 = vld [vmem:[%s2334_s2] sm:$0x3]  ;;  %v457_v59 = vld [vmem:[%s2336_s4 + $0x8] sm:$0xff]  ;;  %s1737_s18 = scalar_lea.vmem %s2277_s17, 2048  ;;  %p2357_p11 = scmp.ne.s32.totalorder %s2349_s23, 0 }
  0x52   : > { %v341_v30 = vadd.f32 %v340_v21, %v2009_v4  ;;  %v372_v56 = vld [vmem:[%s2333_s1] sm:$0x3]  ;;  %v455_v9 = vld [vmem:[%s2335_s3 + $0x8] sm:$0xff]  ;;  %p1738_p3 = scmp.ne.s32.totalorder %s2277_s17, %s1737_s18  ;;  %s1818_s13 = smov [#allocation9]  }
  0x53   : > { %v362_v32 = vmax.f32 %v360_v22, %v361_v26  ;;  %v331_v33 = vadd.f32 %v330_v27, %v2035_v15  ;;  %v351_v34 = vmax.f32 %v349_v28, %v2064_v31  ;;  %v352_v35 = vmax.f32 %v350_v29, %v2056_v25  ;;  %v454_v58 = vld [vmem:[%s2335_s3] sm:$0xff]  ;;  %s1741_s12 = sshll.u32 %s1818_s13, 4  ;;  %s1742_s12 = int_to_ptr.vmem [resolvable:$false] %s1741_s12 }
  0x54   : > { %v342_v36 = vadd.f32 %v341_v30, %v2016_v7  ;;  %1592 = vmatprep.mubr.msk.f32.mxu1 %vm468_vm3, %v454_v58  ;;  %v456_v60 = vld [vmem:[%s2336_s4] sm:$0xff]  ;;  %p1739_p7 = pnand %p1738_p3, %p2357_p11  ;;  %s1743_s20 = scalar_lea.vmem %s1742_s12, 4096 }
  0x55   : > { %363 = vmax.xlane.f32.xlu1 %v362_v32  ;;  %v332_v37 = vadd.f32 %v331_v33, %v2050_v23  ;;  %v353_v38 = vmax.f32 %v351_v34, %v352_v35  ;;  %p1744_p10 = scmp.lt.s32.totalorder %s2277_s17, %s1742_s12  ;;  %p1745_p2 = scmp.lt.s32.totalorder %s1743_s20, %s1737_s18 }
  0x56   : > { %v343_v39 = vadd.f32 %v342_v36, %v2038_v16  ;;  %p1740_p12 = pneg %p1739_p7 }
  0x57   : > { %v333_v40 = vadd.f32 %v332_v37, %v2053_v24  ;;  %p1746_p13 = por %p1745_p2, %p1744_p10 }
  0x58   : > { %v344_v41 = vadd.f32 %v343_v39, %v2019_v8 }
  0x59   : > { %v334_v42 = vadd.f32 %v333_v40, %v2064_v31  ;;  %354 = vmax.xlane.f32.xlu1 %v353_v38  ;;  %p1747_p0 = pnand %p1746_p13, %p1740_p12 }
  0x5a   : > { %345 = vadd.xlane.f32.xlu0 %v344_v41 }
  0x5b   : > { %v335_v43 = vadd.f32 %v334_v42, %v2056_v25 }
  0x5e   : > { %336 = vadd.xlane.f32.xlu0 %v335_v43 }
  0x6a   : > { %465 = vperm.xlu1 %1664, %v457_v59  }
  0x6e   : > { %460 = vperm.xlu1 %1664, %v456_v60  }
  0x74   : > { %376 = vperm.xlu0 %1663, %v373_v46  }
  0xde   : > { %v364_v49 = vpop.xlane.xlu1 %363 }
  0xe2   : > { %v355_v54 = vpop.xlane.xlu1 %354 }
  0xe3   : > { %v346_v50 = vpop.xlane.xlu0 %345 }
  0xe4   : > { %v369_v51 = vmul.f32 0.0009765625, %v346_v50  ;;  %v1817_v50 = vmov 0.0625  }
  0xe6   : > { %v371_v52 = vsel %vm367_vm1, %v369_v51, %v364_v49  ;;  %v466_v11 = vpop.permute.xlu1 %465 }
  0xe7   : > { %1584 = vmatpush3.msra.mxu0 %v371_v52  ;;  %v337_v53 = vpop.xlane.xlu0 %336 }
  0xe8   : > { %v368_v55 = vmul.f32 0.0009765625, %v337_v53  ;;  %1585 = vmatprep.subr.mxu0 %v1813_v44 }
  0xea   : > { %v370_v57 = vsel %vm367_vm1, %v368_v55, %v355_v54  ;;  %v461_v18 = vpop.permute.xlu1 %460 }
  0xeb   : > { %1586 = vmatpush3.msra.mxu0 %v370_v57 }
  0xec   : > { %1588 = vmatmul.mubr.msk.f32.vlgmr.msra.gmra.mxu0 %vm379_vm2, %v372_v56  ;;  %v2180_v56 = vshrl.u32 %v365_v47, 7 }
  0xed   : > { %726 = vmatprep.mubr.f32.mxu0 %v1813_v44 }
  0xef   : > { %v377_v61 = vpop.permute.xlu0 %376 }
 0x1ac   : > { %v449_v62 = vpop.f32.mrf.mxu0 }
 0x1ad   : > { %v450_v63 = vadd.f32 %v449_v62, %v377_v61 }
 0x1ae   : > { %v1589_v5 = vpop.f32.mrf.mxu0 }
 0x1af   : > { %v453_v6 = vmax.f32 %v450_v63, 0.0 }
 0x1b1   : > { %1590 = vmatprep.subr.msk.mxu1 %vm475_vm4, %v453_v6 }
 0x1b2   : > { %1591 = vmatpush3.msk.msra.mxu1 %vm475_vm4, %v453_v6 }
 0x1b3   : > { %1593 = vmatmul.mubr.msk.f32.vlgmr.msra.gmra.mxu1 %vm468_vm3, %v455_v9  ;;  %v1191_v9 = vld [vmem:[#allocation7 + $0x2f8] sm:$0xff] }
 0x1b4   : > { %655 = vmatprep.mubr.f32.mxu1 %v1813_v44 }
 0x273   : > { %v1594_v12 = vpop.f32.mrf.mxu1 }
 0x274   : > { %v551_v17 = vadd.f32 %v1594_v12, %v466_v11  ;;  %v1127_v11 = vld [vmem:[#allocation7 + $0xf8] sm:$0xff] }
 0x275   : > { %v545_v19 = vpop.f32.mrf.mxu1 }
 0x276   : > { %v546_v20 = vadd.f32 %v545_v19, %v461_v18  ;;  %v557_v21 = vsel %vm468_vm3, %v551_v17, 0.0 }
 0x277   : > { %558 = vadd.xlane.f32.xlu1 %v557_v21  ;;  %v1126_v21 = vld [vmem:[#allocation7 + $0xf0] sm:$0xff] }
 0x278   : > { %v554_v22 = vsel %vm468_vm3, %v546_v20, 0.0  ;;  %v1190_v20 = vld [vmem:[#allocation7 + $0x2f0] sm:$0xff] }
 0x279   : > { %555 = vadd.xlane.f32.xlu0 %v554_v22 }
 0x300   : > { %v559_v26 = vpop.xlane.xlu1 %558 }
 0x301   : > { %v1563_v27 = vmul.f32 -1.442695, %v559_v26 }
 0x302   : > { %v556_v28 = vpop.xlane.xlu0 %555 }
 0x303   : > { %1667 = vpow2.f32 %v1563_v27  ;;  %v1562_v29 = vmul.f32 -1.442695, %v556_v28 }
 0x305   : > { %1669 = vpow2.f32 %v1562_v29  ;;  %v1189_v29 = vld [vmem:[#allocation7 + $0x2e8] sm:$0xff] }
 0x310   : > { %v1668_v30 = vpop.eup %1667 }
 0x311   : > { %v567_v32 = vadd.f32 1.0, %v1668_v30  ;;  %v1125_v30 = vld [vmem:[#allocation7 + $0xe8] sm:$0xff] }
 0x312   : > { %v1670_v33 = vpop.eup %1669 }
 0x313   : > { %1671 = vrcp.f32 %v567_v32  ;;  %v566_v34 = vadd.f32 1.0, %v1670_v33 }
 0x315   : > { %1673 = vrcp.f32 %v566_v34 }
 0x320   : > { %v1672_v35 = vpop.eup %1671 }
 0x321   : > { %v2106_v36 = vmul.f32 %v1672_v35, %v2000_v1  ;;  %v2109_v37 = vmul.f32 %v1672_v35, %v2006_v3  ;;  %v2112_v38 = vmul.f32 %v1672_v35, %v1997_v0  ;;  %v2115_v39 = vmul.f32 %v1672_v35, %v2003_v2 }
 0x322   : > { %v1674_v40 = vpop.eup %1673  ;;  %v2118_v41 = vmul.f32 %v1672_v35, %v2016_v7  ;;  %v2121_v42 = vmul.f32 %v1672_v35, %v2019_v8  ;;  %v2124_v43 = vmul.f32 %v1672_v35, %v2009_v4  ;;  %v2127_v1 = vmul.f32 %v1672_v35, %v2038_v16 }
 0x323   : > { %619 = vmatprep.subr.mxu1 %v2106_v36  ;;  %690 = vmatprep.subr.mxu0 %v2109_v37  ;;  %v2132_v0 = vmul.f32 %v1674_v40, %v2029_v13  ;;  %v2135_v2 = vmul.f32 %v1674_v40, %v2035_v15  ;;  %v2138_v3 = vmul.f32 %v1674_v40, %v2024_v10  ;;  %v1816_v15 = vmov 1966171168  }
 0x324   : > { %620 = vmatpush1.msra.mxu1 %v2112_v38  ;;  %691 = vmatpush1.msra.mxu0 %v2115_v39  ;;  %v2143_v4 = vmul.f32 %v1674_v40, %v2032_v14  ;;  %v2146_v7 = vmul.f32 %v1674_v40, %v2053_v24  ;;  %v2149_v8 = vmul.f32 %v1674_v40, %v2056_v25  ;;  %v2159_v16 = vunpack.c.l.s4 %v1816_v15 }
 0x325   : > { %621 = vmatprep.subr.mxu1 %v2132_v0  ;;  %v882_v13 = vmax.f32 %v2132_v0, %v2106_v36  ;;  %692 = vmatprep.subr.mxu0 %v2135_v2  ;;  %v896_v10 = vmax.f32 %v2135_v2, %v2109_v37  ;;  %v875_v14 = vmax.f32 %v2138_v3, %v2112_v38 }
 0x326   : > { %622 = vmatpush1.msra.mxu1 %v2138_v3  ;;  %693 = vmatpush1.msra.mxu0 %v2143_v4  ;;  %v889_v24 = vmax.f32 %v2143_v4, %v2115_v39  ;;  %v910_v25 = vmax.f32 %v2146_v7, %v2118_v41  ;;  %v924_v45 = vmax.f32 %v2149_v8, %v2121_v42 }
 0x327   : > { %v883_v46 = vrot.slane %v882_v13, 4  ;;  %v897_v48 = vrot.slane %v896_v10, 4  ;;  %v876_v49 = vrot.slane %v875_v14, 4  ;;  %1564 = vmatmul.mubr.msk.f32.vlgmr.msra.gmra.mxu1 %vm379_vm2, %v1817_v50  ;;  %1565 = vmatmul.mubr.msk.f32.vlgmr.msra.gmra.mxu0 %vm379_vm2, %v1817_v50  ;;  %v2172_v51 = vmul.f32 %v1674_v40, %v2050_v23 }
 0x328   : > { %v890_v52 = vrot.slane %v889_v24, 4  ;;  %761 = vmatprep.subr.mxu1 %v2118_v41  ;;  %832 = vmatprep.subr.mxu0 %v2121_v42  ;;  %v911_v53 = vrot.slane %v910_v25, 4  ;;  %v925_v54 = vrot.slane %v924_v45, 4  ;;  %v2177_v55 = vmul.f32 %v1674_v40, %v2064_v31  ;;  %v1188_v40 = vld [vmem:[#allocation7 + $0x2e0] sm:$0xff] }
 0x329   : > { %v884_v57 = vmax.f32 %v882_v13, %v883_v46  ;;  %v898_v58 = vmax.f32 %v896_v10, %v897_v48  ;;  %v877_v59 = vmax.f32 %v875_v14, %v876_v49  ;;  %762 = vmatpush1.msra.mxu1 %v2124_v43  ;;  %833 = vmatpush1.msra.mxu0 %v2127_v1  ;;  %v936_v23 = vunpack.c.0.s8 %v2159_v16  ;;  %v1187_v16 = vld [vmem:[#allocation7 + $0x2d8] sm:$0xff]  ;;  %v1186_v49 = vld [vmem:[#allocation7 + $0x2d0] sm:$0xff] }
 0x32a   : > { %v891_v60 = vmax.f32 %v889_v24, %v890_v52  ;;  %763 = vmatprep.subr.mxu1 %v2146_v7  ;;  %v912_v61 = vmax.f32 %v910_v25, %v911_v53  ;;  %834 = vmatprep.subr.mxu0 %v2149_v8  ;;  %v926_v31 = vmax.f32 %v924_v45, %v925_v54  ;;  %v1123_v24 = vld [vmem:[#allocation7 + $0xd8] sm:$0xff] }
 0x32b   : > { %v885_v62 = vrot.slane %v884_v57, 2  ;;  %v899_v63 = vrot.slane %v898_v58, 2  ;;  %v878_v5 = vrot.slane %v877_v59, 2  ;;  %764 = vmatpush1.msra.mxu1 %v2172_v51  ;;  %v903_v6 = vmax.f32 %v2172_v51, %v2124_v43  ;;  %797 = vmatprep.mubr.f32.mxu1 %v1813_v44 }
 0x32c   : > { %v892_v12 = vrot.slane %v891_v60, 2  ;;  %v913_v17 = vrot.slane %v912_v61, 2  ;;  %v927_v18 = vrot.slane %v926_v31, 2  ;;  %835 = vmatpush1.msra.mxu0 %v2177_v55  ;;  %v917_v19 = vmax.f32 %v2177_v55, %v2127_v1  ;;  %868 = vmatprep.mubr.f32.mxu0 %v1813_v44  ;;  %v1124_v44 = vld [vmem:[#allocation7 + $0xe0] sm:$0xff] }
 0x32d   : > { %v886_v22 = vmax.f32 %v884_v57, %v885_v62  ;;  %v900_v26 = vmax.f32 %v898_v58, %v899_v63  ;;  %v879_v27 = vmax.f32 %v877_v59, %v878_v5  ;;  %v904_v28 = vrot.slane %v903_v6, 4  ;;  %1566 = vmatmul.mubr.msk.f32.vlgmr.msra.gmra.mxu1 %vm379_vm2, %v1817_v50  ;;  %1567 = vmatmul.mubr.msk.f32.vlgmr.msra.gmra.mxu0 %vm379_vm2, %v1817_v50  ;;  %v1122_v50 = vld [vmem:[#allocation7 + $0xd0] sm:$0xff]  ;;  %v1185_v58 = vld [vmem:[#allocation7 + $0x2c8] sm:$0xff]  ;;  %v1120_v62 = vld [vmem:[#allocation7 + $0xc0] sm:$0xff] }
 0x32e   : > { %v893_v32 = vmax.f32 %v891_v60, %v892_v12  ;;  %v914_v33 = vmax.f32 %v912_v61, %v913_v17  ;;  %v928_v34 = vmax.f32 %v926_v31, %v927_v18  ;;  %v918_v35 = vrot.slane %v917_v19, 4  ;;  %1303 = vmatprep.subr.mxu0 %v1191_v9  ;;  %1232 = vmatprep.subr.mxu1 %v1127_v11  ;;  %v1121_v59 = vld [vmem:[#allocation7 + $0xc8] sm:$0xff]  ;;  %v1119_v9 = vld [vmem:[#allocation7 + $0xb8] sm:$0xff]  ;;  %v1182_v17 = vld [vmem:[#allocation7 + $0x2b0] sm:$0xff] }
 0x32f   : > { %v887_v13 = vrot.slane %v886_v22, 1  ;;  %v901_v10 = vrot.slane %v900_v26, 1  ;;  %v880_v14 = vrot.slane %v879_v27, 1  ;;  %v905_v15 = vmax.f32 %v903_v6, %v904_v28  ;;  %1304 = vmatpush1.msra.mxu0 %v1190_v20  ;;  %1233 = vmatpush1.msra.mxu1 %v1126_v21  ;;  %v1183_v6 = vld [vmem:[#allocation7 + $0x2b8] sm:$0xff]  ;;  %v1118_v18 = vld [vmem:[#allocation7 + $0xb0] sm:$0xff] }
 0x330   : > { %v2198_v25 = vsub.s32 %v936_v23, %v2180_v56  ;;  %v894_v45 = vrot.slane %v893_v32, 1  ;;  %v915_v46 = vrot.slane %v914_v33, 1  ;;  %v919_v48 = vmax.f32 %v917_v19, %v918_v35  ;;  %1305 = vmatprep.subr.mxu0 %v1189_v29  ;;  %1234 = vmatprep.subr.mxu1 %v1125_v30  ;;  %v1184_v23 = vld [vmem:[#allocation7 + $0x2c0] sm:$0xff] }
 0x331   : > { %v888_v52 = vmax.f32 %v886_v22, %v887_v13  ;;  %v902_v53 = vmax.f32 %v900_v26, %v901_v10  ;;  %v881_v54 = vmax.f32 %v879_v27, %v880_v14  ;;  %v906_v57 = vrot.slane %v905_v15, 2  ;;  %1306 = vmatpush1.msra.mxu0 %v1188_v40  ;;  %1235 = vmatpush1.msra.mxu1 %v1124_v44  ;;  %v1181_v22 = vld [vmem:[#allocation7 + $0x2a8] sm:$0xff]  ;;  %v1116_v35 = vld [vmem:[#allocation7 + $0xa0] sm:$0xff]  ;;  %v1179_v44 = vld [vmem:[#allocation7 + $0x298] sm:$0xff] }
 0x332   : > { %v895_v60 = vmax.f32 %v893_v32, %v894_v45  ;;  %v929_v61 = vrot.slane %v928_v34, 1  ;;  %v920_v31 = vrot.slane %v919_v48, 2  ;;  %1307 = vmatprep.subr.mxu0 %v1187_v16  ;;  %1236 = vmatprep.subr.mxu1 %v1123_v24  ;;  %v916_v20 = vmax.f32 %v914_v33, %v915_v46  ;;  %v1117_v26 = vld [vmem:[#allocation7 + $0xa8] sm:$0xff]  ;;  %v1180_v32 = vld [vmem:[#allocation7 + $0x2a0] sm:$0xff]  ;;  %v1115_v13 = vld [vmem:[#allocation7 + $0x98] sm:$0xff] }
 0x333   : > { %v956_v63 = vcombine.low %v881_v54, %v888_v52  ;;  %v907_v5 = vmax.f32 %v905_v15, %v906_v57  ;;  %1308 = vmatpush1.msra.mxu0 %v1186_v49  ;;  %1237 = vmatpush1.msra.mxu1 %v1122_v50  ;;  %v1178_v14 = vld [vmem:[#allocation7 + $0x290] sm:$0xff]  ;;  %v1177_v16 = vld [vmem:[#allocation7 + $0x288] sm:$0xff]  ;;  %v1176_v46 = vld [vmem:[#allocation7 + $0x280] sm:$0xff] }
 0x334   : > { %v996_v11 = vcombine.low %v895_v60, %v902_v53  ;;  %v921_v12 = vmax.f32 %v919_v48, %v920_v31  ;;  %1309 = vmatprep.subr.mxu0 %v1185_v58  ;;  %1238 = vmatprep.subr.mxu1 %v1121_v59  ;;  %v930_v29 = vmax.f32 %v928_v34, %v929_v61  ;;  %v1114_v15 = vld [vmem:[#allocation7 + $0x90] sm:$0xff]  ;;  %v1113_v24 = vld [vmem:[#allocation7 + $0x88] sm:$0xff]  ;;  %v1112_v48 = vld [vmem:[#allocation7 + $0x80] sm:$0xff] }
 0x335   : > { %v963_v19 = vrot.slane %v956_v63, %v2198_v25  ;;  %v908_v21 = vrot.slane %v907_v5, 1  ;;  %1310 = vmatpush1.msra.mxu0 %v1184_v23  ;;  %1239 = vmatpush1.msra.mxu1 %v1120_v62  ;;  %v1175_v50 = vld [vmem:[#allocation7 + $0x278] sm:$0xff]  ;;  %v1174_v54 = vld [vmem:[#allocation7 + $0x270] sm:$0xff]  ;;  %v1173_v59 = vld [vmem:[#allocation7 + $0x268] sm:$0xff] }
 0x336   : > { %v1003_v28 = vrot.slane %v996_v11, %v2198_v25  ;;  %v922_v30 = vrot.slane %v921_v12, 1  ;;  %1311 = vmatprep.subr.mxu0 %v1183_v6  ;;  %1240 = vmatprep.subr.mxu1 %v1119_v9  ;;  %v1111_v52 = vld [vmem:[#allocation7 + $0x78] sm:$0xff]  ;;  %v1110_v57 = vld [vmem:[#allocation7 + $0x70] sm:$0xff]  ;;  %v1109_v60 = vld [vmem:[#allocation7 + $0x68] sm:$0xff] }
 0x337   : > { %v970_v33 = vrot.slane %v963_v19, %v2198_v25  ;;  %v909_v40 = vmax.f32 %v907_v5, %v908_v21  ;;  %1312 = vmatpush1.msra.mxu0 %v1182_v17  ;;  %1241 = vmatpush1.msra.mxu1 %v1118_v18  ;;  %v1172_v31 = vld [vmem:[#allocation7 + $0x260] sm:$0xff]  ;;  %v1171_v62 = vld [vmem:[#allocation7 + $0x258] sm:$0xff]  ;;  %v1170_v5 = vld [vmem:[#allocation7 + $0x250] sm:$0xff] }
 0x338   : > { %v1010_v47 = vrot.slane %v1003_v28, %v2198_v25  ;;  %v923_v10 = vmax.f32 %v921_v12, %v922_v30  ;;  %1313 = vmatprep.subr.mxu0 %v1181_v22  ;;  %1242 = vmatprep.subr.mxu1 %v1117_v26  ;;  %v1108_v23 = vld [vmem:[#allocation7 + $0x60] sm:$0xff]  ;;  %v1107_v63 = vld [vmem:[#allocation7 + $0x58] sm:$0xff]  ;;  %v1106_v6 = vld [vmem:[#allocation7 + $0x50] sm:$0xff] }
 0x339   : > { %973 = vst.msk [vmem:[#allocation2 + $0x8] ss:$4 sm:$0x3] %vm2202_vm5, %v970_v33  ;;  %v1036_v34 = vcombine.low %v909_v40, %v916_v20  ;;  %1314 = vmatpush1.msra.mxu0 %v1180_v32  ;;  %1243 = vmatpush1.msra.mxu1 %v1116_v35  ;;  %v1169_v9 = vld [vmem:[#allocation7 + $0x248] sm:$0xff]  ;;  %v1168_v12 = vld [vmem:[#allocation7 + $0x240] sm:$0xff]  ;;  %v1167_v18 = vld [vmem:[#allocation7 + $0x238] sm:$0xff] }
 0x33a   : > { %1013 = vst.msk [vmem:[#allocation2 + $0x9] ss:$4 sm:$0x3] %vm2202_vm5, %v1010_v47  ;;  %v1076_v45 = vcombine.low %v923_v10, %v930_v29  ;;  %1315 = vmatprep.subr.mxu0 %v1179_v44  ;;  %1244 = vmatprep.subr.mxu1 %v1115_v13  ;;  %v1105_v11 = vld [vmem:[#allocation7 + $0x48] sm:$0xff]  ;;  %v1104_v17 = vld [vmem:[#allocation7 + $0x40] sm:$0xff]  ;;  %v1103_v19 = vld [vmem:[#allocation7 + $0x38] sm:$0xff] }
 0x33b   : > { %v1043_v49 = vrot.slane %v1036_v34, %v2198_v25  ;;  %1316 = vmatpush1.msra.mxu0 %v1178_v14  ;;  %1245 = vmatpush1.msra.mxu1 %v1114_v15  ;;  %v1166_v20 = vld [vmem:[#allocation7 + $0x230] sm:$0xff]  ;;  %v1165_v22 = vld [vmem:[#allocation7 + $0x228] sm:$0xff]  ;;  %v1164_v28 = vld [vmem:[#allocation7 + $0x220] sm:$0xff] }
 0x33c   : > { %v1083_v53 = vrot.slane %v1076_v45, %v2198_v25  ;;  %1317 = vmatprep.subr.mxu0 %v1177_v16  ;;  %1246 = vmatprep.subr.mxu1 %v1113_v24  ;;  %v1102_v21 = vld [vmem:[#allocation7 + $0x30] sm:$0xff]  ;;  %v1101_v26 = vld [vmem:[#allocation7 + $0x28] sm:$0xff]  ;;  %v1100_v29 = vld [vmem:[#allocation7 + $0x20] sm:$0xff] }
 0x33d   : > { %v1050_v58 = vrot.slane %v1043_v49, %v2198_v25  ;;  %1318 = vmatpush1.msra.mxu0 %v1176_v46  ;;  %1247 = vmatpush1.msra.mxu1 %v1112_v48  ;;  %v1163_v32 = vld [vmem:[#allocation7 + $0x218] sm:$0xff]  ;;  %v1162_v33 = vld [vmem:[#allocation7 + $0x210] sm:$0xff]  ;;  %v1161_v44 = vld [vmem:[#allocation7 + $0x208] sm:$0xff] }
 0x33e   : > { %v1090_v61 = vrot.slane %v1083_v53, %v2198_v25  ;;  %1319 = vmatprep.subr.mxu0 %v1175_v50  ;;  %1248 = vmatprep.subr.mxu1 %v1111_v52  ;;  %v1099_v40 = vld [vmem:[#allocation7 + $0x18] sm:$0xff]  ;;  %v1098_v13 = vld [vmem:[#allocation7 + $0x10] sm:$0xff]  ;;  %v1160_v47 = vld [vmem:[#allocation7 + $0x200] sm:$0xff] }
 0x33f   : > { %1053 = vst.msk [vmem:[#allocation2 + $0xa] ss:$4 sm:$0x3] %vm2202_vm5, %v1050_v58  ;;  %1320 = vmatpush1.msra.mxu0 %v1174_v54  ;;  %1249 = vmatpush1.msra.mxu1 %v1110_v57  ;;  %v1097_v10 = vld [vmem:[#allocation7 + $0x8] sm:$0xff]  ;;  %v1223_v14 = vld [vmem:[#allocation7 + $0x3f8] sm:$0xff]  ;;  %v1096_v15 = vld [vmem:[#allocation7] sm:$0xff] }
 0x340   : > { %1093 = vst.msk [vmem:[#allocation2 + $0xb] ss:$4 sm:$0x3] %vm2202_vm5, %v1090_v61  ;;  %1321 = vmatprep.subr.mxu0 %v1173_v59  ;;  %1250 = vmatprep.subr.mxu1 %v1109_v60  ;;  %v1222_v34 = vld [vmem:[#allocation7 + $0x3f0] sm:$0xff]  ;;  %v1159_v16 = vld [vmem:[#allocation7 + $0x1f8] sm:$0xff]  ;;  %v1221_v24 = vld [vmem:[#allocation7 + $0x3e8] sm:$0xff] }
 0x341   : > { %1322 = vmatpush1.msra.mxu0 %v1172_v31  ;;  %1251 = vmatpush1.msra.mxu1 %v1108_v23  ;;  %v1158_v45 = vld [vmem:[#allocation7 + $0x1f0] sm:$0xff]  ;;  %v1220_v46 = vld [vmem:[#allocation7 + $0x3e0] sm:$0xff]  ;;  %v1157_v48 = vld [vmem:[#allocation7 + $0x1e8] sm:$0xff] }
 0x342   : > { %1323 = vmatprep.subr.mxu0 %v1171_v62  ;;  %1252 = vmatprep.subr.mxu1 %v1107_v63  ;;  %v1219_v49 = vld [vmem:[#allocation7 + $0x3d8] sm:$0xff]  ;;  %v1156_v50 = vld [vmem:[#allocation7 + $0x1e0] sm:$0xff]  ;;  %v1218_v52 = vld [vmem:[#allocation7 + $0x3d0] sm:$0xff] }
 0x343   : > { %1324 = vmatpush1.msra.mxu0 %v1170_v5  ;;  %1253 = vmatpush1.msra.mxu1 %v1106_v6  ;;  %v1155_v53 = vld [vmem:[#allocation7 + $0x1d8] sm:$0xff]  ;;  %v1217_v54 = vld [vmem:[#allocation7 + $0x3c8] sm:$0xff]  ;;  %v1154_v57 = vld [vmem:[#allocation7 + $0x1d0] sm:$0xff] }
 0x344   : > { %1325 = vmatprep.subr.mxu0 %v1169_v9  ;;  %1254 = vmatprep.subr.mxu1 %v1105_v11  ;;  %v1216_v58 = vld [vmem:[#allocation7 + $0x3c0] sm:$0xff]  ;;  %v1153_v59 = vld [vmem:[#allocation7 + $0x1c8] sm:$0xff]  ;;  %v1215_v60 = vld [vmem:[#allocation7 + $0x3b8] sm:$0xff] }
 0x345   : > { %1326 = vmatpush1.msra.mxu0 %v1168_v12  ;;  %1255 = vmatpush1.msra.mxu1 %v1104_v17  ;;  %v1152_v61 = vld [vmem:[#allocation7 + $0x1c0] sm:$0xff]  ;;  %v1214_v31 = vld [vmem:[#allocation7 + $0x3b0] sm:$0xff]  ;;  %v1213_v23 = vld [vmem:[#allocation7 + $0x3a8] sm:$0xff] }
 0x346   : > { %1327 = vmatprep.subr.mxu0 %v1167_v18  ;;  %1256 = vmatprep.subr.mxu1 %v1103_v19  ;;  %v1212_v62 = vld [vmem:[#allocation7 + $0x3a0] sm:$0xff]  ;;  %v1211_v63 = vld [vmem:[#allocation7 + $0x398] sm:$0xff]  ;;  %v1210_v5 = vld [vmem:[#allocation7 + $0x390] sm:$0xff] }
 0x347   : > { %v2221_v30 = vld [vmem:[#allocation2 + $0x8] sm:$0xff]  ;;  %1328 = vmatpush1.msra.mxu0 %v1166_v20  ;;  %1257 = vmatpush1.msra.mxu1 %v1102_v21  ;;  %v1209_v6 = vld [vmem:[#allocation7 + $0x388] sm:$0xff]  ;;  %v1208_v9 = vld [vmem:[#allocation7 + $0x380] sm:$0xff] }
 0x348   : > { %v1229_v35 = vcombine.high %v2221_v30, %v2221_v30  ;;  %1329 = vmatprep.subr.mxu0 %v1165_v22  ;;  %1258 = vmatprep.subr.mxu1 %v1101_v26  ;;  %v1207_v11 = vld [vmem:[#allocation7 + $0x378] sm:$0xff]  ;;  %v1206_v12 = vld [vmem:[#allocation7 + $0x370] sm:$0xff]  ;;  %v1205_v17 = vld [vmem:[#allocation7 + $0x368] sm:$0xff] }
 0x349   : > { %1330 = vmatpush1.msra.mxu0 %v1164_v28  ;;  %1259 = vmatpush1.msra.mxu1 %v1100_v29  ;;  %v1204_v18 = vld [vmem:[#allocation7 + $0x360] sm:$0xff]  ;;  %v1203_v19 = vld [vmem:[#allocation7 + $0x358] sm:$0xff]  ;;  %v1202_v20 = vld [vmem:[#allocation7 + $0x350] sm:$0xff] }
 0x34a   : > { %1367 = vmatprep.mubr.f32.mxu0 %v1229_v35  ;;  %1331 = vmatprep.subr.mxu0 %v1163_v32  ;;  %v1201_v21 = vld [vmem:[#allocation7 + $0x348] sm:$0xff]  ;;  %v1200_v22 = vld [vmem:[#allocation7 + $0x340] sm:$0xff]  ;;  %v1199_v26 = vld [vmem:[#allocation7 + $0x338] sm:$0xff] }
 0x34b   : > { %1332 = vmatpush1.msra.mxu0 %v1162_v33  ;;  %1260 = vmatprep.subr.mxu1 %v1099_v40  ;;  %v1198_v28 = vld [vmem:[#allocation7 + $0x330] sm:$0xff]  ;;  %v1197_v29 = vld [vmem:[#allocation7 + $0x328] sm:$0xff]  ;;  %v1196_v32 = vld [vmem:[#allocation7 + $0x320] sm:$0xff] }
 0x34c   : > { %1333 = vmatprep.subr.mxu0 %v1161_v44  ;;  %1261 = vmatpush1.msra.mxu1 %v1098_v13  ;;  %v1195_v35 = vld [vmem:[#allocation7 + $0x318] sm:$0xff]  ;;  %v1150_v40 = vld [vmem:[#allocation7 + $0x1b0] sm:$0xff]  ;;  %v1193_v13 = vld [vmem:[#allocation7 + $0x308] sm:$0xff] }
 0x34d   : > { %1334 = vmatpush1.msra.mxu0 %v1160_v47  ;;  %1262 = vmatprep.subr.mxu1 %v1097_v10  ;;  %v1151_v33 = vld [vmem:[#allocation7 + $0x1b8] sm:$0xff]  ;;  %v1194_v44 = vld [vmem:[#allocation7 + $0x310] sm:$0xff]  ;;  %v1192_v47 = vld [vmem:[#allocation7 + $0x300] sm:$0xff] }
 0x34e   : > { %1335 = vmatprep.subr.mxu0 %v1223_v14  ;;  %1263 = vmatpush1.msra.mxu1 %v1096_v15  ;;  %v1149_v10 = vld [vmem:[#allocation7 + $0x1a8] sm:$0xff]  ;;  %v1148_v14 = vld [vmem:[#allocation7 + $0x1a0] sm:$0xff]  ;;  %v1147_v15 = vld [vmem:[#allocation7 + $0x198] sm:$0xff] }
 0x34f   : > { %1336 = vmatpush2.msra.mxu0 %v1222_v34  ;;  %1264 = vmatprep.subr.mxu1 %v1159_v16  ;;  %v1146_v34 = vld [vmem:[#allocation7 + $0x190] sm:$0xff]  ;;  %v1145_v16 = vld [vmem:[#allocation7 + $0x188] sm:$0xff] }
 0x350   : > { %1337 = vmatprep.subr.mxu0 %v1221_v24  ;;  %1265 = vmatpush2.msra.mxu1 %v1158_v45  ;;  %v1144_v24 = vld [vmem:[#allocation7 + $0x180] sm:$0xff]  ;;  %v1143_v45 = vld [vmem:[#allocation7 + $0x178] sm:$0xff] }
 0x351   : > { %1338 = vmatpush2.msra.mxu0 %v1220_v46  ;;  %1266 = vmatprep.subr.mxu1 %v1157_v48  ;;  %v1142_v46 = vld [vmem:[#allocation7 + $0x170] sm:$0xff]  ;;  %v1141_v48 = vld [vmem:[#allocation7 + $0x168] sm:$0xff] }
 0x352   : > { %1339 = vmatprep.subr.mxu0 %v1219_v49  ;;  %1267 = vmatpush2.msra.mxu1 %v1156_v50  ;;  %v1140_v49 = vld [vmem:[#allocation7 + $0x160] sm:$0xff]  ;;  %v1139_v50 = vld [vmem:[#allocation7 + $0x158] sm:$0xff] }
 0x353   : > { %1340 = vmatpush2.msra.mxu0 %v1218_v52  ;;  %1268 = vmatprep.subr.mxu1 %v1155_v53  ;;  %v1137_v52 = vld [vmem:[#allocation7 + $0x148] sm:$0xff]  ;;  %v1136_v53 = vld [vmem:[#allocation7 + $0x140] sm:$0xff] }
 0x354   : > { %1341 = vmatprep.subr.mxu0 %v1217_v54  ;;  %1269 = vmatpush2.msra.mxu1 %v1154_v57  ;;  %v1135_v54 = vld [vmem:[#allocation7 + $0x138] sm:$0xff]  ;;  %v1134_v57 = vld [vmem:[#allocation7 + $0x130] sm:$0xff] }
 0x355   : > { %1342 = vmatpush2.msra.mxu0 %v1216_v58  ;;  %1270 = vmatprep.subr.mxu1 %v1153_v59  ;;  %v1133_v58 = vld [vmem:[#allocation7 + $0x128] sm:$0xff]  ;;  %v1132_v59 = vld [vmem:[#allocation7 + $0x120] sm:$0xff] }
 0x356   : > { %1343 = vmatprep.subr.mxu0 %v1215_v60  ;;  %1271 = vmatpush2.msra.mxu1 %v1152_v61  ;;  %v1131_v60 = vld [vmem:[#allocation7 + $0x118] sm:$0xff]  ;;  %v1130_v61 = vld [vmem:[#allocation7 + $0x110] sm:$0xff] }
 0x357   : > { %1344 = vmatpush2.msra.mxu0 %v1214_v31  ;;  %1272 = vmatprep.subr.mxu1 %v1151_v33  ;;  %v1129_v31 = vld [vmem:[#allocation7 + $0x108] sm:$0xff] }
 0x358   : > { %1345 = vmatprep.subr.mxu0 %v1213_v23  ;;  %1273 = vmatpush2.msra.mxu1 %v1150_v40  ;;  %v1128_v23 = vld [vmem:[#allocation7 + $0x100] sm:$0xff] }
 0x359   : > { %1346 = vmatpush2.msra.mxu0 %v1212_v62  ;;  %1274 = vmatprep.subr.mxu1 %v1149_v10 }
 0x35a   : > { %1347 = vmatprep.subr.mxu0 %v1211_v63  ;;  %1275 = vmatpush2.msra.mxu1 %v1148_v14 }
 0x35b   : > { %1348 = vmatpush2.msra.mxu0 %v1210_v5  ;;  %1276 = vmatprep.subr.mxu1 %v1147_v15 }
 0x35c   : > { %1349 = vmatprep.subr.mxu0 %v1209_v6  ;;  %1277 = vmatpush2.msra.mxu1 %v1146_v34 }
 0x35d   : > { %1350 = vmatpush2.msra.mxu0 %v1208_v9  ;;  %1278 = vmatprep.subr.mxu1 %v1145_v16 }
 0x35e   : > { %1351 = vmatprep.subr.mxu0 %v1207_v11  ;;  %1279 = vmatpush2.msra.mxu1 %v1144_v24 }
 0x35f   : > { %1352 = vmatpush2.msra.mxu0 %v1206_v12  ;;  %1280 = vmatprep.subr.mxu1 %v1143_v45 }
 0x360   : > { %1353 = vmatprep.subr.mxu0 %v1205_v17  ;;  %1281 = vmatpush2.msra.mxu1 %v1142_v46 }
 0x361   : > { %1354 = vmatpush2.msra.mxu0 %v1204_v18  ;;  %1282 = vmatprep.subr.mxu1 %v1141_v48 }
 0x362   : > { %1355 = vmatprep.subr.mxu0 %v1203_v19  ;;  %1283 = vmatpush2.msra.mxu1 %v1140_v49 }
 0x363   : > { %1356 = vmatpush2.msra.mxu0 %v1202_v20  ;;  %1284 = vmatprep.subr.mxu1 %v1139_v50 }
 0x364   : > { %1357 = vmatprep.subr.mxu0 %v1201_v21 }
 0x365   : > { %1358 = vmatpush2.msra.mxu0 %v1200_v22 }
 0x366   : > { %1359 = vmatprep.subr.mxu0 %v1199_v26 }
 0x367   : > { %1360 = vmatpush2.msra.mxu0 %v1198_v28 }
 0x368   : > { %1361 = vmatprep.subr.mxu0 %v1197_v29 }
 0x369   : > { %1362 = vmatpush2.msra.mxu0 %v1196_v32 }
 0x36a   : > { %1363 = vmatprep.subr.mxu0 %v1195_v35 }
 0x36b   : > { %1364 = vmatpush2.msra.mxu0 %v1194_v44 }
 0x36c   : > { %1365 = vmatprep.subr.mxu0 %v1193_v13 }
 0x36d   : > { %1366 = vmatpush2.msra.mxu0 %v1192_v47  ;;  %v1225_v47 = vstv %s1224_s24 }
 0x36e   : > { %1368 = vmatmul.mubr.f32.vlgmr.msra.gmra.mxu0 %v2221_v30  ;;  %v1138_v30 = vld [vmem:[#allocation7 + $0x150] sm:$0xff] }
 0x36f   : > { %1285 = vmatpush2.msra.mxu1 %v1138_v30 }
 0x370   : > { %1286 = vmatprep.subr.mxu1 %v1137_v52  ;;  %v1388_v52 = vsub.s32 0, %v2180_v56 }
 0x371   : > { %1287 = vmatpush2.msra.mxu1 %v1136_v53  ;;  %v1404_v53 = vsub.s32 1, %v2180_v56 }
 0x372   : > { %1288 = vmatprep.subr.mxu1 %v1135_v54  ;;  %v1420_v54 = vsub.s32 2, %v2180_v56 }
 0x373   : > { %1289 = vmatpush2.msra.mxu1 %v1134_v57  ;;  %v1436_v57 = vsub.s32 3, %v2180_v56 }
 0x374   : > { %1290 = vmatprep.subr.mxu1 %v1133_v58 }
 0x375   : > { %1291 = vmatpush2.msra.mxu1 %v1132_v59 }
 0x376   : > { %1292 = vmatprep.subr.mxu1 %v1131_v60 }
 0x377   : > { %1293 = vmatpush2.msra.mxu1 %v1130_v61 }
 0x378   : > { %1294 = vmatprep.subr.mxu1 %v1129_v31 }
 0x379   : > { %1295 = vmatpush2.msra.mxu1 %v1128_v23 }
 0x3e7   : > { %v657_v62 = vpop.f32.mrf.mxu1  ;;  %v728_v63 = vpop.f32.mrf.mxu0 }
 0x3e9   : > { %v659_v5 = vpop.f32.mrf.mxu1  ;;  %v730_v6 = vpop.f32.mrf.mxu0 }
 0x3ea   : > { %v933_v9 = vcombine.low %v657_v62, %v659_v5  ;;  %v976_v11 = vcombine.low %v728_v63, %v730_v6 }
 0x3ec   : > { %v940_v12 = vrot.slane %v933_v9, %v2198_v25  ;;  %v983_v17 = vrot.slane %v976_v11, %v2198_v25 }
 0x3ed   : > { %v799_v18 = vpop.f32.mrf.mxu1  ;;  %v870_v19 = vpop.f32.mrf.mxu0 }
 0x3ee   : > { %v947_v20 = vrot.slane %v940_v12, %v2198_v25  ;;  %v990_v21 = vrot.slane %v983_v17, %v2198_v25 }
 0x3ef   : > { %v801_v22 = vpop.f32.mrf.mxu1  ;;  %v872_v26 = vpop.f32.mrf.mxu0 }
 0x3f0   : > { %953 = vst.msk [vmem:[#allocation2] ss:$4 sm:$0x3] %vm2202_vm5, %v947_v20  ;;  %993 = vst.msk [vmem:[#allocation2 + $0x1] ss:$4 sm:$0x3] %vm2202_vm5, %v990_v21  ;;  %v1016_v28 = vcombine.low %v799_v18, %v801_v22  ;;  %v1056_v29 = vcombine.low %v870_v19, %v872_v26 }
 0x3f2   : > { %v1023_v32 = vrot.slane %v1016_v28, %v2198_v25  ;;  %v1063_v35 = vrot.slane %v1056_v29, %v2198_v25 }
 0x3f4   : > { %v1030_v33 = vrot.slane %v1023_v32, %v2198_v25  ;;  %v1070_v40 = vrot.slane %v1063_v35, %v2198_v25 }
 0x3f6   : > { %1033 = vst.msk [vmem:[#allocation2 + $0x2] ss:$4 sm:$0x3] %vm2202_vm5, %v1030_v33  ;;  %1073 = vst.msk [vmem:[#allocation2 + $0x3] ss:$4 sm:$0x3] %vm2202_vm5, %v1070_v40 }
 0x3fd   : > { %v1094_v44 = vld [vmem:[#allocation2] sm:$0xff] }
 0x3fe   : > { %v1228_v13 = vcombine.high %v1094_v44, %v1094_v44 }
 0x400   : > { %1296 = vmatprep.mubr.f32.mxu1 %v1228_v13 }
 0x401   : > { %1297 = vmatmul.mubr.f32.vlgmr.msra.gmra.mxu1 %v1094_v44 }
 0x42e   : > { %v1369_v10 = vpop.f32.mrf.mxu0 }
 0x430   : > { %v1371_v45 = vpop.f32.mrf.mxu0 }
 0x4c1   : > { %v1298_v14 = vpop.f32.mrf.mxu1 }
 0x4c2   : > { %v1299_v15 = vadd.f32 %v1298_v14, %v1225_v47 }
 0x4c3   : > { %v1300_v34 = vpop.f32.mrf.mxu1 }
 0x4c4   : > { %v1370_v16 = vadd.f32 %v1369_v10, %v1299_v15  ;;  %v1301_v24 = vadd.f32 %v1300_v34, %v1225_v47 }
 0x4c6   : > { %v1568_v25 = vmul.f32 -1.442695, %v1370_v16  ;;  %v1372_v46 = vadd.f32 %v1371_v45, %v1301_v24 }
 0x4c8   : > { %1675 = vpow2.f32 %v1568_v25  ;;  %v1569_v48 = vmul.f32 -1.442695, %v1372_v46 }
 0x4ca   : > { %1677 = vpow2.f32 %v1569_v48 }
 0x4d5   : > { %v1676_v27 = vpop.eup %1675 }
 0x4d6   : > { %v1380_v49 = vadd.f32 1.0, %v1676_v27 }
 0x4d7   : > { %v1678_v50 = vpop.eup %1677 }
 0x4d8   : > { %1679 = vrcp.f32 %v1380_v49  ;;  %v1381_v30 = vadd.f32 1.0, %v1678_v50 }
 0x4da   : > { %1681 = vrcp.f32 %v1381_v30 }
 0x4e5   : > { %v1680_v58 = vpop.eup %1679 }
 0x4e6   : > { %v1389_v59 = vrot.slane %v1680_v58, %v1388_v52  ;;  %v1405_v60 = vrot.slane %v1680_v58, %v1404_v53  ;;  %v1421_v61 = vrot.slane %v1680_v58, %v1420_v54  ;;  %v1437_v31 = vrot.slane %v1680_v58, %v1436_v57 }
 0x4e7   : > { %v1682_v23 = vpop.eup %1681 }
 0x4e8   : > { %v1394_v62 = vmul.f32 %v1389_v59, %v2138_v3  ;;  %v1396_v63 = vmul.f32 %v1389_v59, %v2112_v38  ;;  %v1410_v5 = vmul.f32 %v1405_v60, %v2143_v4  ;;  %v1412_v6 = vmul.f32 %v1405_v60, %v2115_v39 }
 0x4e9   : > { %v1426_v9 = vmul.f32 %v1421_v61, %v2172_v51  ;;  %v1428_v11 = vmul.f32 %v1421_v61, %v2124_v43  ;;  %v1442_v56 = vmul.f32 %v1437_v31, %v2177_v55  ;;  %v1444_v12 = vmul.f32 %v1437_v31, %v2127_v1 }
 0x4ea   : > { %1398 = vst [vmem:[%s2257_s10] sm:$0xff] %v1394_v62  ;;  %1400 = vst [vmem:[%s2257_s10 + $0x40] sm:$0xff] %v1396_v63  ;;  %v1393_v38 = vrot.slane %v1682_v23, %v1388_v52  ;;  %v1409_v39 = vrot.slane %v1682_v23, %v1404_v53  ;;  %v1425_v43 = vrot.slane %v1682_v23, %v1420_v54 }
 0x4eb   : > { %1414 = vst [vmem:[%s2257_s10 + $0x10] sm:$0xff] %v1410_v5  ;;  %1416 = vst [vmem:[%s2257_s10 + $0x50] sm:$0xff] %v1412_v6  ;;  %v1441_v1 = vrot.slane %v1682_v23, %v1436_v57 }
 0x4ec   : > { %1430 = vst [vmem:[%s2257_s10 + $0x20] sm:$0xff] %v1426_v9  ;;  %1432 = vst [vmem:[%s2257_s10 + $0x60] sm:$0xff] %v1428_v11  ;;  %v1395_v3 = vmul.f32 %v1393_v38, %v2132_v0  ;;  %v1397_v4 = vmul.f32 %v1393_v38, %v2106_v36  ;;  %v1411_v51 = vmul.f32 %v1409_v39, %v2135_v2 }
 0x4ed   : > { %1446 = vst [vmem:[%s2257_s10 + $0x30] sm:$0xff] %v1442_v56  ;;  %1448 = vst [vmem:[%s2257_s10 + $0x70] sm:$0xff] %v1444_v12  ;;  %v1413_v55 = vmul.f32 %v1409_v39, %v2109_v37  ;;  %v1427_v0 = vmul.f32 %v1425_v43, %v2146_v7  ;;  %v1429_v36 = vmul.f32 %v1425_v43, %v2118_v41 }
 0x4ee   : > { %v1443_v17 = vmul.f32 %v1441_v1, %v2149_v8  ;;  %v1445_v2 = vmul.f32 %v1441_v1, %v2121_v42  ;;  %1399 = vst [vmem:[%s2257_s10 + $0x8] sm:$0xff] %v1395_v3  ;;  %1401 = vst [vmem:[%s2257_s10 + $0x48] sm:$0xff] %v1397_v4 }
 0x4ef   : > { %1415 = vst [vmem:[%s2257_s10 + $0x18] sm:$0xff] %v1411_v51  ;;  %1417 = vst [vmem:[%s2257_s10 + $0x58] sm:$0xff] %v1413_v55 }
 0x4f0   : > { %1431 = vst [vmem:[%s2257_s10 + $0x28] sm:$0xff] %v1427_v0  ;;  %1433 = vst [vmem:[%s2257_s10 + $0x68] sm:$0xff] %v1429_v36 }
 0x4f1   : > { %1447 = vst [vmem:[%s2257_s10 + $0x38] sm:$0xff] %v1443_v17  ;;  %1449 = vst [vmem:[%s2257_s10 + $0x78] sm:$0xff] %v1445_v2 }
 0x4f2   : > { %1750 = shalt.err (!%p1747_p0)
}
 0x4f3   : > { %s1751_s19 = scalar_lea.hbm %s2275_s15, 2048  ;;  %s1755_s24 = scalar_lea.hbm %s2339_s7, 4096 }
 0x4f4   : > { %p1752_p5 = scmp.ne.s32.totalorder %s2275_s15, %s1751_s19  ;;  %p1756_p4 = scmp.lt.s32.totalorder %s2275_s15, %s2339_s7 }
 0x4f5   : > { %p1757_p6 = scmp.lt.s32.totalorder %s1755_s24, %s1751_s19 }
 0x4f6   : > { %p1753_p9 = pnand %p1752_p5, %p2357_p11 }
 0x4f7   : > { %p1758_p8 = por %p1757_p6, %p1756_p4 }
 0x4f8   : > { %p1754_p1 = pneg %p1753_p9 }
 0x4fa   : > { %p1759_p3 = pnand %p1758_p8, %p1754_p1 }
 0x4fc   : > { %1762 = shalt.err (!%p1759_p3)
}
 0x4fd   : > { %s1819_s6 = smov 1024   ;;  %s1820_s30 = smov 64  }
 0x4fe   : > { %1601 = dma.vmem_to_hbm [thread:$0]  (%p2357_p11), %s2277_s17, 2048, %s2275_s15, %s1451_s16, %s1819_s6, %s1819_s6, %s1820_s30  }
 0x4ff PF: > { %s1479_s18 = sand.u32 1, %s1793_s26   ;;  %p2358_p7 = scmp.ne.s32.totalorder %s2345_s9, 0 }
 0x500   : > { %p2359_p12 = scmp.ge.s32.totalorder %s1805_s29, 2  ;;  %s1480_s13 = scalar_lea.sflag [#allocation6], %s1479_s18 }
 0x502   : > { %p1612_p10 = pnand %p2359_p12, %p2358_p7 }
 0x504   : > { %p1613_p2 = pneg %p1612_p10 }
 0x506   : > { %1788 = dma.done.wait (%p1613_p2), %s1480_s13, 2048  }
 0x507   : > { %1790 = vsyncadd (%p1613_p2), %s1480_s13, 4294965248  ;;  %p22_p13 = scmp.ge.s32.totalorder %s1918_s14, 4   ;;  %s2360_s26 = smov %s1797_s27 }
 0x508   : > { %s2361_s27 = smov %s1801_s28  ;;  %s2362_s28 = smov %s1935_s22 }
 0x509   : > { %s2363_s29 = smov %s1918_s14  ;;  %24 = sbr.rel (!%p22_p13) target bundleno = 8 (0x8), region = 104 }
 0x50e   :  { %1485 = vsyncpa [#allocation5], 1 }
 0x50f   :  { %1487 = vsyncpa [#allocation5 + $0x1], 1 }
 0x510   :  { %1488 = vsyncpa [#allocation8], 1 }
 0x511   :  { %1489 = vsyncpa [#allocation6], 1 }
 0x512   :  { %1491 = vsyncpa [#allocation6 + $0x1], 1 }

</bundles_post_ra>
